<compile_context>
chip_gen: v7x
topology: tpu7x:2x2x1
jax: 0.10.0
libtpu: 0.0.40
codegen_flags: <defaults>
</compile_context>

<pallas_src>
import functools

import jax
import jax.numpy as jnp
from jax import lax
from jax.experimental import pallas as pl
from jax.experimental.pallas import tpu as pltpu

_LANES = 128
# Background focal loss of this logit underflows to exactly 0, so masked /
# out-of-bounds elements contribute nothing to the sum.
_NEG_FILL = -1e9


def _round_up(x, m):
    return (x + m - 1) // m * m


def _focal_background_kernel(x_ref, partial_ref, *, alpha, gamma, n_rows,
                             tile_rows, need_mask):
    """Per-tile sum of the t==0 ("background") sigmoid-focal-loss term."""
    x = x_ref[...].astype(jnp.float32)                    # (tile_rows, lanes)
    if need_mask:                                          # static branch
        row0 = pl.program_id(0) * tile_rows
        row_ids = row0 + lax.broadcasted_iota(jnp.int32, x.shape, 0)
        x = jnp.where(row_ids < n_rows, x, _NEG_FILL)      # kill tail rows
    # One shared transcendental drives both softplus and sigmoid.
    e = jnp.exp(-jnp.abs(x))
    softplus = jnp.maximum(x, 0.0) + jnp.log1p(e)          # -log(1-sigmoid(x))
    # approx=True -> single EUP vrcp (co-issues with exp/log1p); ~1e-3 rel.
    p = jnp.where(x >= 0.0, 1.0, e) * pl.reciprocal(1.0 + e, approx=True)
    if gamma == 2.0:                                       # static branch
        w = p * p
    else:
        w = jnp.power(p, gamma)                            # p in [0,1)
    loss = (1.0 - alpha) * w * softplus
    # Sublane-only reduce -> (1, lanes) partial per tile.
    partial_ref[...] = jnp.sum(loss, axis=0, keepdims=True)


def _focal_background_sum(pred_logits, *, alpha, gamma, block_rows=1024):
    """sum over all (b, q, c) of sigmoid_focal_loss(x, target=0), in Pallas.

    The input is consumed through a free (bitcast) reshape -- no padded copy
    of the logits is written to HBM.
    """
    n_elem = pred_logits.size
    # Lane-dense slab when possible, otherwise the natural (B*Q, C) row view.
    lanes = _LANES if (n_elem % _LANES == 0) else pred_logits.shape[-1]
    n_rows = n_elem // lanes
    slab = pred_logits.reshape(n_rows, lanes)              # free view

    if n_rows <= block_rows:
        tile_rows = n_rows                                 # full-dim block
    else:
        tile_rows = _round_up(block_rows, 8)
    num_tiles = pl.cdiv(n_rows, tile_rows)
    need_mask = (n_rows % tile_rows) != 0                  # tail tile only

    kernel = functools.partial(
        _focal_background_kernel, alpha=alpha, gamma=gamma, n_rows=n_rows,
        tile_rows=tile_rows, need_mask=need_mask)

    cost = pl.CostEstimate(
        flops=10 * n_elem,
        transcendentals=3 * n_elem,
        bytes_accessed=n_elem * pred_logits.dtype.itemsize
        + num_tiles * lanes * 4)

    partials = pl.pallas_call(
        kernel,
        out_shape=jax.ShapeDtypeStruct((num_tiles, lanes), jnp.float32),
        grid_spec=pltpu.PrefetchScalarGridSpec(
            num_scalar_prefetch=0,
            grid=(num_tiles,),
            in_specs=[pl.BlockSpec((tile_rows, lanes), lambda i: (i, 0))],
            out_specs=pl.BlockSpec((1, lanes), lambda i: (i, 0)),
        ),
        compiler_params=pltpu.CompilerParams(
            dimension_semantics=("parallel",)),            # megacore on v7x
        cost_estimate=cost,
    )(slab)
    return jnp.sum(partials)


def _bce_pos(x):  # -log(sigmoid(x)), numerically stable
    return jnp.maximum(x, 0.0) - x + jnp.log1p(jnp.exp(-jnp.abs(x)))


def _bce_neg(x):  # -log(1 - sigmoid(x)), numerically stable
    return jnp.maximum(x, 0.0) + jnp.log1p(jnp.exp(-jnp.abs(x)))


def set_criterion_forward(pred_logits, m_logits, m_labels, m_src_cps,
                          m_tgt_cps, num_objects, *, focal_alpha, focal_gamma,
                          block_rows=1024):
    """SetCriterion forward (focal_loss=True branch).

    pred_logits : (B, Q, C) float  raw class logits (f32 or bf16)
    m_logits    : (N, C)   float   pred_logits gathered at matched (b, q)
    m_labels    : (N,)     int32   matched target class per pair
    m_src_cps   : (N, 2)   float   pred center points at matched (b, q)
    m_tgt_cps   : (N, 2)   float   matched target center points
    num_objects : float            total number of target objects
    """
    alpha, gamma = focal_alpha, focal_gamma

    # ---- hot path: focal loss over all B*Q*C logits (Pallas) ---------------
    s_background = _focal_background_sum(pred_logits, alpha=alpha, gamma=gamma,
                                         block_rows=block_rows)

    # ---- tiny matched-pair epilogue (plain JAX, exact math) ----------------
    # Clamp guards the degenerate zero-object case; no effect for >= 1 object.
    nobj = jnp.maximum(jnp.asarray(num_objects, jnp.float32), 1.0)

    x_m = jnp.take_along_axis(m_logits.astype(jnp.float32),
                              m_labels.astype(jnp.int32)[:, None],
                              axis=1)[:, 0]                # matched logit
    p_m = jax.nn.sigmoid(x_m)
    if gamma == 2.0:
        w_pos = (1.0 - p_m) * (1.0 - p_m)
        w_neg = p_m * p_m
    else:
        w_pos = jnp.power(1.0 - p_m, gamma)
        w_neg = jnp.power(p_m, gamma)
    pos_term = alpha * w_pos * _bce_pos(x_m)               # t == 1 term
    neg_term = (1.0 - alpha) * w_neg * _bce_neg(x_m)       # counted above
    correction = jnp.sum(pos_term - neg_term)

    # torch: sigmoid_focal_loss(...).mean(1).sum() / num_objects * Q
    #      == loss.sum() / num_objects
    loss_ce = (s_background + correction) / nobj

    # class_error = 100 - top-1 accuracy on matched pairs
    # (with zero matched pairs this reports 100.0 instead of NaN)
    n_match = int(m_labels.shape[0])
    pred_cls = jnp.argmax(m_logits, axis=-1)
    acc = jnp.sum((pred_cls == m_labels).astype(jnp.float32)) / max(n_match, 1)
    class_error = 100.0 - 100.0 * acc

    # L1 center-point loss (sum) / num_objects
    loss_cp = jnp.sum(jnp.abs(m_src_cps - m_tgt_cps)) / nobj

    return {"loss_ce": loss_ce, "class_error": class_error,
            "loss_center_point": loss_cp}


if __name__ == "__main__":
    # TODO(synk): the Hungarian matcher (scipy.linear_sum_assignment) has no
    # clean Pallas equivalent; deterministic match indices are provided here.
    # TODO(synk): only the focal_loss=True branch is implemented (the weighted
    # cross-entropy branch of loss_labels is not exercised by this config).
    B, Q, C = 2, 8, 4            # batch, num_queries, num_classes
    focal_alpha, focal_gamma = 0.25, 2.0

    key = jax.random.PRNGKey(0)
    k1, k2, k3, k4 = jax.random.split(key, 4)
    pred_logits = jax.random.normal(k1, (B, Q, C), dtype=jnp.float32)
    pred_center_points = jax.nn.sigmoid(
        jax.random.normal(k2, (B, Q, 2), dtype=jnp.float32))

    # synthetic targets: labels + center points per image
    tgt_labels = [
        jax.random.randint(k3, (3,), 0, C).astype(jnp.int32),
        jax.random.randint(k4, (2,), 0, C).astype(jnp.int32),
    ]
    tgt_cps = [
        jax.random.uniform(jax.random.PRNGKey(1), (3, 2), dtype=jnp.float32),
        jax.random.uniform(jax.random.PRNGKey(2), (2, 2), dtype=jnp.float32),
    ]

    # deterministic "matcher" output: list of (src_query_idx, tgt_idx)
    indices = [
        (jnp.array([5, 1, 3], jnp.int32), jnp.array([0, 2, 1], jnp.int32)),
        (jnp.array([2, 6], jnp.int32), jnp.array([1, 0], jnp.int32)),
    ]
    num_objects = float(sum(int(l.shape[0]) for l in tgt_labels))

    # _get_src_permutation_idx + matched gathers (plain-JAX glue)
    batch_idx = jnp.concatenate(
        [jnp.full_like(src, i) for i, (src, _) in enumerate(indices)])
    src_idx = jnp.concatenate([src for src, _ in indices])
    target_classes_o = jnp.concatenate(
        [l[j] for l, (_, j) in zip(tgt_labels, indices)])
    m_logits = pred_logits[batch_idx, src_idx]                    # (N, C)
    m_src_cps = pred_center_points[batch_idx, src_idx]            # (N, 2)
    m_tgt_cps = jnp.concatenate(
        [cp[j] for cp, (_, j) in zip(tgt_cps, indices)], axis=0)  # (N, 2)

    losses = set_criterion_forward(
        pred_logits, m_logits, target_classes_o, m_src_cps, m_tgt_cps,
        num_objects, focal_alpha=focal_alpha, focal_gamma=focal_gamma)
    losses = jax.tree_util.tree_map(jax.block_until_ready, losses)

    # ---- pure-JAX reference (mirrors the PyTorch module) -------------------
    target_classes = jnp.full((B, Q), C, dtype=jnp.int32)
    target_classes = target_classes.at[batch_idx, src_idx].set(target_classes_o)
    onehot = jax.nn.one_hot(target_classes, C + 1, dtype=jnp.float32)[..., :C]
    prob = jax.nn.sigmoid(pred_logits)
    ce = (jnp.maximum(pred_logits, 0.0) - pred_logits * onehot
          + jnp.log1p(jnp.exp(-jnp.abs(pred_logits))))
    p_t = prob * onehot + (1 - prob) * (1 - onehot)
    l = ce * (1 - p_t) ** focal_gamma
    a_t = focal_alpha * onehot + (1 - focal_alpha) * (1 - onehot)
    l = a_t * l
    ref_loss_ce = l.mean(axis=1).sum() / num_objects * Q
    pred_cls = jnp.argmax(m_logits, axis=-1)
    ref_class_error = 100.0 - 100.0 * jnp.mean(
        (pred_cls == target_classes_o).astype(jnp.float32))
    ref_loss_cp = jnp.abs(m_src_cps - m_tgt_cps).sum() / num_objects

    # approx reciprocal in the bulk kernel -> loosened rtol on loss_ce
    assert jnp.allclose(losses["loss_ce"], ref_loss_ce, rtol=5e-3, atol=1e-4)
    assert jnp.allclose(losses["class_error"], ref_class_error,
                        rtol=1e-4, atol=1e-4)
    assert jnp.allclose(losses["loss_center_point"], ref_loss_cp,
                        rtol=1e-4, atol=1e-5)

    # ---- 2nd check: lane-dense path, multiple tiles + masked tail tile -----
    B2, Q2, C2 = 2, 100, 64      # n_elem = 12800, divisible by 128 lanes
    x2 = jax.random.normal(jax.random.PRNGKey(3), (B2, Q2, C2),
                           dtype=jnp.float32)
    got = _focal_background_sum(x2, alpha=focal_alpha, gamma=focal_gamma,
                                block_rows=32)       # 100 rows -> 4 tiles
    got = jax.block_until_ready(got)
    p2 = jax.nn.sigmoid(x2)
    ref_bg = jnp.sum((1.0 - focal_alpha) * p2 ** focal_gamma
                     * (jnp.maximum(x2, 0.0) + jnp.log1p(jnp.exp(-jnp.abs(x2)))))
    assert jnp.allclose(got, ref_bg, rtol=5e-3, atol=1e-3)

    # bf16 input contract (kernel upcasts internally; no wrapper-side cast)
    got_bf16 = _focal_background_sum(x2.astype(jnp.bfloat16),
                                     alpha=focal_alpha, gamma=focal_gamma)
    got_bf16 = jax.block_until_ready(got_bf16)
    assert jnp.allclose(got_bf16, ref_bg, rtol=3e-2, atol=1e-1)

    print("KERNEL_OK")
</pallas_src>

<mosaic_0001>
module attributes {stable_mosaic.version = 11 : i64} {
  func.func @_focal_background_kernel(%arg0: i32, %arg1: memref<16x4xf32, #tpu.memory_space<vmem>>, %arg2: memref<1x4xf32, #tpu.memory_space<vmem>>) attributes {dimension_semantics = [#tpu.dimension_semantics<parallel>], iteration_bounds = array<i64: 1>, scalar_prefetch = 0 : i64, scratch_operands = 0 : i64, tpu.core_type = #tpu.core_type<tc>, window_params = [{transform_indices = @transform_0, window_bounds = array<i64: 16, 4>}, {transform_indices = @transform_1, window_bounds = array<i64: 1, 4>}]} {
    %c0 = arith.constant 0 : index
    %c0_0 = arith.constant 0 : index
    %0 = vector.load %arg1[%c0, %c0_0] : memref<16x4xf32, #tpu.memory_space<vmem>>, vector<16x4xf32>
    %1 = math.absf %0 : vector<16x4xf32>
    %cst = arith.constant 0.000000e+00 : f32
    %2 = vector.broadcast %cst : f32 to vector<16x4xf32>
    %3 = arith.subf %2, %1 : vector<16x4xf32>
    %4 = math.exp %3 : vector<16x4xf32>
    %cst_1 = arith.constant 0.000000e+00 : f32
    %5 = vector.broadcast %cst_1 : f32 to vector<16x4xf32>
    %6 = arith.maximumf %0, %5 : vector<16x4xf32>
    %7 = math.log1p %4 : vector<16x4xf32>
    %8 = arith.addf %6, %7 : vector<16x4xf32>
    %cst_2 = arith.constant 0.000000e+00 : f32
    %9 = vector.broadcast %cst_2 : f32 to vector<16x4xf32>
    %10 = arith.cmpf oge, %0, %9 : vector<16x4xf32>
    %cst_3 = arith.constant 1.000000e+00 : f32
    %11 = vector.broadcast %cst_3 : f32 to vector<16x4xf32>
    %12 = arith.select %10, %11, %4 : vector<16x4xi1>, vector<16x4xf32>
    %cst_4 = arith.constant 1.000000e+00 : f32
    %13 = vector.broadcast %cst_4 : f32 to vector<16x4xf32>
    %14 = arith.addf %13, %4 : vector<16x4xf32>
    %15 = tpu.reciprocal %14 {approx = true} : vector<16x4xf32> -> vector<16x4xf32>
    %16 = arith.mulf %12, %15 : vector<16x4xf32>
    %17 = arith.mulf %16, %16 : vector<16x4xf32>
    %cst_5 = arith.constant 7.500000e-01 : f32
    %18 = vector.broadcast %cst_5 : f32 to vector<16x4xf32>
    %19 = arith.mulf %18, %17 : vector<16x4xf32>
    %20 = arith.mulf %19, %8 : vector<16x4xf32>
    %cst_6 = arith.constant dense<0.000000e+00> : vector<4xf32>
    %21 = vector.multi_reduction <add>, %20, %cst_6 [0] : vector<16x4xf32> to vector<4xf32>
    %22 = vector.shape_cast %21 : vector<4xf32> to vector<1x4xf32>
    %c0_7 = arith.constant 0 : index
    %c0_8 = arith.constant 0 : index
    %23 = vector.load %arg2[%c0_7, %c0_8] : memref<1x4xf32, #tpu.memory_space<vmem>>, vector<1x4xf32>
    tpu.vector_store %arg2[%c0_7, %c0_8], %22 {strides = array<i32>} : memref<1x4xf32, #tpu.memory_space<vmem>>, vector<1x4xf32>,
    return
  }
  func.func @transform_0(%arg0: i32) -> (i32, i32) {
    %c0_i32 = arith.constant 0 : i32
    %c0_i32_0 = arith.constant 0 : i32
    return %arg0, %c0_i32 : i32, i32
  }
  func.func @transform_1(%arg0: i32) -> (i32, i32) {
    %c0_i32 = arith.constant 0 : i32
    %c0_i32_0 = arith.constant 0 : i32
    return %arg0, %c0_i32 : i32, i32
  }
}

</mosaic_0001>

<bundles_post_ra>
// kernel: tpu_custom_call.1
= control target key start
LH: loop header
LB: loop body
LE: loop exit
PB: predicated region body
PF: predicated region fallthrough
CT: control target
= control target key end

     0   :  { %s155_s0 = inlined_call_operand.vmem [shape: f32[16,4], index: 0, kind: input, shape index: {}]   ;;  %s156_s1 = inlined_call_operand.hbm [shape: f32[1,4], index: 1, kind: output, shape index: {}]  }
   0x1   :  { %v9_v0 = vld [vmem:[%s155_s0] sm:$0xff]  ;;  %v10_v1 = vld [vmem:[%s155_s0 + $0x8] sm:$0xff] }
   0x2   :  { %6 = vsyncpa [#allocation3], 0  ;;  %v11_v2 = vand.u32 2147483647, %v9_v0  ;;  %v12_v3 = vand.u32 2147483647, %v10_v1 }
   0x3   :  { %vm41_vm0 = vcmp.ge.f32.partialorder %v9_v0, 0.0  ;;  %vm42_vm1 = vcmp.ge.f32.partialorder %v10_v1, 0.0  ;;  %v19_v24 = vmax.f32 %v9_v0, 0.0  ;;  %v20_v28 = vmax.f32 %v10_v1, 0.0  ;;  %s120_s0 = smov [#allocation2]  }
   0x4   :  { %v13_v4 = vsub.f32 0.0, %v11_v2  ;;  %v14_v5 = vsub.f32 0.0, %v12_v3  ;;  %vm57_vm4 = vcmask 31744   ;;  %s75_s10 = sshll.u32 %s120_s0, 4  ;;  %vm67_vm5 = vcmask 24576   ;;  %s76_s10 = int_to_ptr.vmem [resolvable:$true] %s75_s10 }
   0x5   :  { %s96_s11 = scalar_lea.vmem %s76_s10, 16  ;;  %s100_s12 = scalar_lea.vmem %s76_s10, 32 }
   0x6   :  { %v15_v6 = vmul.f32 1.442695, %v13_v4  ;;  %v17_v7 = vmul.f32 1.442695, %v14_v5  ;;  %p97_p0 = scmp.ne.s32.totalorder %s76_s10, %s96_s11  ;;  %p101_p1 = scmp.lt.s32.totalorder %s76_s10, %s76_s10 }
   0x7   :  { %p102_p2 = scmp.lt.s32.totalorder %s100_s12, %s96_s11 }
   0x8   :  { %84 = vpow2.f32 %v15_v6 }
   0x9   :  { %86 = vpow2.f32 %v17_v7  ;;  %p103_p3 = por %p102_p2, %p101_p1 }
   0xb   :  { %p104_p4 = pnand %p103_p3, %p97_p0 }
  0x12   :  { %v85_v8 = vpop.eup %84 }
  0x13   :  { %v87_v9 = vpop.eup %86  ;;  %v21_v10 = vadd.f32 1.0, %v85_v8  ;;  %v24_v12 = vmul.f32 -0.5, %v85_v8  ;;  %v27_v15 = vand.u32 2147483647, %v85_v8  ;;  %v43_v22 = vsel %vm41_vm0, 1.0, %v85_v8 }
  0x14   :  { %v30_v11 = vadd.f32 1.0, %v87_v9  ;;  %v33_v13 = vmul.f32 -0.5, %v87_v9  ;;  %v36_v17 = vand.u32 2147483647, %v87_v9  ;;  %v44_v26 = vsel %vm42_vm1, 1.0, %v87_v9 }
  0x15   :  { %88 = vlog2.f32 %v21_v10  ;;  %v25_v14 = vadd.f32 1.0, %v24_v12  ;;  %vm137_vm2 = vcmp.lt.f32.partialorder %v27_v15, 0.0004427343 }
  0x16   :  { %90 = vlog2.f32 %v30_v11  ;;  %v34_v16 = vadd.f32 1.0, %v33_v13  ;;  %vm37_vm3 = vcmp.lt.f32.partialorder %v36_v17, 0.0004427343 }
  0x17   :  { %92 = vrcp.f32 %v21_v10  ;;  %v26_v18 = vmul.f32 %v85_v8, %v25_v14 }
  0x18   :  { %94 = vrcp.f32 %v30_v11  ;;  %v35_v21 = vmul.f32 %v87_v9, %v34_v16 }
  0x1f   :  { %v89_v19 = vpop.eup %88 }
  0x20   :  { %v91_v23 = vpop.eup %90  ;;  %v23_v25 = vmul.f32 0.6931472, %v89_v19 }
  0x21   :  { %v93_v27 = vpop.eup %92  ;;  %v32_v29 = vmul.f32 0.6931472, %v91_v23 }
  0x22   :  { %v95_v30 = vpop.eup %94  ;;  %v29_v31 = vsel %vm137_vm2, %v26_v18, %v23_v25  ;;  %v49_v32 = vmul.f32 %v93_v27, %v43_v22 }
  0x23   :  { %v38_v33 = vsel %vm37_vm3, %v35_v21, %v32_v29  ;;  %v50_v34 = vmul.f32 %v95_v30, %v44_v26  ;;  %v39_v35 = vadd.f32 %v29_v31, %v19_v24 }
  0x24   :  { %v51_v36 = vmul.f32 %v49_v32, %v49_v32  ;;  %v40_v37 = vadd.f32 %v38_v33, %v20_v28 }
  0x25   :  { %v52_v38 = vmul.f32 %v50_v34, %v50_v34 }
  0x26   :  { %v53_v39 = vmul.f32 0.75, %v51_v36 }
  0x27   :  { %v54_v40 = vmul.f32 0.75, %v52_v38 }
  0x28   :  { %v55_v41 = vmul.f32 %v53_v39, %v39_v35 }
  0x29   :  { %v56_v42 = vmul.f32 %v54_v40, %v40_v37 }
  0x2a   :  { %v58_v43 = vsel %vm57_vm4, %v55_v41, 0.0 }
  0x2b   :  { %v59_v44 = vsel %vm57_vm4, %v56_v42, 0.0 }
  0x2c   :  { %v60_v45 = vadd.f32 %v59_v44, %v58_v43 }
  0x2e   :  { %v61_v46 = vrot.slane %v60_v45, 4 }
  0x30   :  { %v62_v47 = vadd.f32 %v61_v46, %v60_v45 }
  0x32   :  { %v63_v48 = vrot.slane %v62_v47, 2 }
  0x34   :  { %v64_v49 = vadd.f32 %v63_v48, %v62_v47 }
  0x36   :  { %v65_v50 = vrot.slane %v64_v49, 1 }
  0x38   :  { %v66_v51 = vadd.f32 %v65_v50, %v64_v49 }
  0x3a   :  { %68 = vst.msk [vmem:[#allocation2] sm:$0x1] %vm67_vm5, %v66_v51 }
  0x3b   :  { %107 = shalt.err (!%p104_p4)
}
  0x3c   :  { %s108_s15 = scalar_lea.hbm %s156_s1, 16 }
  0x3d   :  { %p109_p5 = scmp.ne.s32.totalorder %s156_s1, %s108_s15  ;;  %p112_p6 = scmp.lt.u32.totalorder %s108_s15, %s156_s1 }
  0x3f   :  { %p114_p7 = pnand %p112_p6, %p109_p5 }
  0x41   :  { %117 = shalt.err (!%p114_p7)
}
  0x42   :  { %78 = dma.vmem_to_hbm [thread:$0]  %s76_s10, 16, %s156_s1, [#allocation3]  }
  0x43   :  { %118 = dma.done.wait [#allocation3], 16  }
  0x44   :  { %119 = vsyncadd [#allocation3], 4294967280 }
  0x45   :  { %82 = vsyncpa [#allocation3], 1 }

</bundles_post_ra>
